<compile_context>
chip_gen: v6e
topology: v6e:2x2x1
jax: 0.10.0
libtpu: 0.0.40
codegen_flags: <defaults>
</compile_context>

<pallas_src>
import functools

import jax
import jax.numpy as jnp
from jax.experimental import pallas as pl
from jax.experimental.pallas import tpu as pltpu


_STEP_OVERHEAD_BYTES = 350 * 1024   # ~0.35 us fixed per-grid-step cost @ ~1 TB/s


def _round_up(a, m):
    return -(-a // m) * m


def _choose_tiles(B, C, HW, itemsize, target_tile_bytes, spatial_tile_cap):
    """Jointly pick (TB, THW).

    Legality is guaranteed by construction (full-extent row dims, THW a
    multiple of 128), so selection is purely a cost trade-off:
      1. block must fit the per-block VMEM budget,
      2. prefer nb = B // TB >= 2 so v7x's two TensorCores both get work,
      3. minimise modelled cost = steps * (block bytes + per-step overhead).
    """
    sub = 8 if itemsize >= 4 else 16                 # sublane packing f32 / bf16
    top = max(128, min(spatial_tile_cap, (HW // 128) * 128))
    thw_cands = sorted({c for c in (128, 256, 512, 1024, 2048, 4096, 8192, 16384)
                        if c <= top} | {top})

    options = []
    for tb in range(1, B + 1):
        if B % tb:
            continue
        nb = B // tb
        tr_pad = _round_up(tb * C, sub)
        for thw in thw_cands:
            blk = tr_pad * thw * itemsize
            ns = -(-HW // thw)
            cost = nb * ns * (blk + _STEP_OVERHEAD_BYTES)
            options.append((blk, nb, cost, tb, thw))

    feasible = [o for o in options if o[0] <= target_tile_bytes]
    if feasible:
        best = max(feasible, key=lambda o: (o[1] >= 2, -o[2], o[0]))
    else:                                             # nothing fits: smallest block
        best = min(options, key=lambda o: o[0])
    return best[3], best[4]


def _feature_extractor_kernel(x_ref, w_rep_ref, sel_ref, b_ref, o_ref, acc_ref,
                              *, hw):
    # x_ref:     (1, TR, THW)  flattened rows = (batch, channel), spatial on lanes
    # w_rep_ref: (TR, Fpad)    weight rows repeated per batch row, scaled by 1/(H*W)
    # sel_ref:   (TB, TR)      one-hot row -> local-batch selection matrix
    # b_ref:     (1, Fpad)     bias, zero-padded to 128 lanes
    # o_ref:     (1, TB, Fpad) output block (resident across the reduction axis)
    # acc_ref:   VMEM (TR, 128) f32 lane-wise running spatial sums
    # hw:        number of valid spatial columns actually stored in HBM
    tr, thw = x_ref.shape[1], x_ref.shape[2]
    s = pl.program_id(1)

    @pl.when(s == 0)
    def _init():
        acc_ref[...] = jnp.zeros_like(acc_ref)

    # Lane-wise partial sums: pure vld + vadd over 128-lane chunks (no per-step
    # cross-lane reduction); f32 accumulation even for bf16 inputs.
    rem = hw % thw                      # static; nonzero => ragged tail to mask
    lane = jax.lax.broadcasted_iota(jnp.int32, (1, 128), 1)
    partial = jnp.zeros((tr, 128), jnp.float32)
    for j in range(thw // 128):
        chunk = x_ref[0, :, pl.ds(j * 128, 128)].astype(jnp.float32)
        if rem and (j + 1) * 128 > rem:            # chunk may contain OOB columns
            col = lane + (s * thw + j * 128)
            chunk = jnp.where(col < hw, chunk, 0.0)
        partial = partial + chunk
    acc_ref[...] += partial

    @pl.when(s == pl.num_programs(1) - 1)
    def _finalize():
        # mean-pool @ W  ==  sel @ (row_sums * W_rep)   (1/(H*W) folded into W_rep)
        row_sums = jnp.sum(acc_ref[...], axis=-1, keepdims=True)        # (TR, 1)
        contrib = row_sums * w_rep_ref[...]                             # (TR, Fpad)
        y = jnp.dot(sel_ref[...], contrib,
                    preferred_element_type=jnp.float32)                 # (TB, Fpad)
        y = jnp.maximum(y + b_ref[...], 0.0)
        # TODO(synk): Dropout(0.1) is identity in eval mode; training-mode dropout
        # (pltpu.prng_random_bits masking) intentionally not emitted.
        o_ref[0] = y.astype(o_ref.dtype)


def feature_extractor(x, weight, bias, *,
                      target_tile_bytes=8 << 20, spatial_tile_cap=16384):
    """x: (B, C, H, W); weight: (C, F); bias: (F,) -> (B, F)."""
    B, C, H, W = x.shape
    C_w, F_out = weight.shape
    assert C_w == C
    HW = H * W
    itemsize = x.dtype.itemsize
    target_tile_bytes = min(int(target_tile_bytes), 12 << 20)  # keep 2x block << VMEM

    # Sublane/lane-dense flat layout for the bandwidth-bound pooling (free reshape).
    x_rows = x.reshape(B * C, HW)
    if HW < 128:
        # Tiny spatial extent: pad lanes to 128 once (zeros don't perturb sums).
        x_rows = jnp.pad(x_rows, ((0, 0), (0, 128 - HW)))
    HW_data = x_rows.shape[1]

    TB, THW = _choose_tiles(B, C, HW_data, itemsize,
                            target_tile_bytes, spatial_tile_cap)
    TR = TB * C
    nb = B // TB
    ns = pl.cdiv(HW_data, THW)

    # 3-D views: row dims are full-extent, so the (8,128) rule holds for any TB.
    x3 = x_rows.reshape(nb, TR, HW_data)

    # Lane-dense output / weight: pad feature dim up to a multiple of 128.
    F_pad = _round_up(F_out, 128)

    # One-time (trace-level) transforms of the tiny parameters:
    #   * fold the 1/(H*W) average into the weight,
    #   * zero-pad features to F_pad lanes,
    #   * repeat (C, F_pad) once per batch element of a tile (no in-kernel reshape),
    #   * one-hot selection matrix mapping tile row r -> local batch r // C.
    w_scaled = weight.astype(jnp.float32) / float(HW)
    w_pad = jnp.zeros((C, F_pad), jnp.float32).at[:, :F_out].set(w_scaled)
    w_rep = jnp.tile(w_pad, (TB, 1))                                    # (TR, F_pad)
    b_pad = jnp.zeros((1, F_pad), jnp.float32).at[0, :F_out].set(
        bias.astype(jnp.float32))
    sel = (jax.lax.broadcasted_iota(jnp.int32, (TB, TR), 1) // C
           == jax.lax.broadcasted_iota(jnp.int32, (TB, TR), 0)
           ).astype(jnp.float32)                                        # (TB, TR)

    # Explicit scoped-VMEM budget: 2x double-buffered x blocks + params + out + acc.
    sub = 8 if itemsize >= 4 else 16
    x_blk = _round_up(TR, sub) * THW * itemsize
    param_bytes = (_round_up(TR, 8) * F_pad * 4
                   + _round_up(TB, 8) * _round_up(TR, 128) * 4
                   + 8 * F_pad * 4)
    out_blk = _round_up(TB, sub) * F_pad * itemsize
    acc_bytes = _round_up(TR, 8) * 128 * 4
    vmem_limit = int(min(max(2 * x_blk + 2 * param_bytes + 2 * out_blk
                             + acc_bytes + (4 << 20), 16 << 20), 30 << 20))

    cost = pl.CostEstimate(
        flops=int(B * C * HW_data + 2 * B * C * F_out),
        transcendentals=0,
        bytes_accessed=int(x3.size * itemsize + w_rep.size * 4 + sel.size * 4
                           + b_pad.size * 4 + B * F_pad * itemsize),
    )

    out = pl.pallas_call(
        functools.partial(_feature_extractor_kernel, hw=HW_data),
        out_shape=jax.ShapeDtypeStruct((nb, TB, F_pad), x.dtype),
        grid_spec=pltpu.PrefetchScalarGridSpec(
            num_scalar_prefetch=0,
            grid=(nb, ns),                        # reduction (spatial) axis last
            in_specs=[
                pl.BlockSpec((1, TR, THW), lambda b, s: (b, 0, s)),
                pl.BlockSpec((TR, F_pad), lambda b, s: (0, 0)),
                pl.BlockSpec((TB, TR), lambda b, s: (0, 0)),
                pl.BlockSpec((1, F_pad), lambda b, s: (0, 0)),
            ],
            out_specs=pl.BlockSpec((1, TB, F_pad), lambda b, s: (b, 0, 0)),
            scratch_shapes=[pltpu.VMEM((TR, 128), jnp.float32)],
        ),
        compiler_params=pltpu.CompilerParams(
            dimension_semantics=("parallel", "arbitrary"),
            vmem_limit_bytes=vmem_limit,
        ),
        cost_estimate=cost,
    )(x3, w_rep, sel, b_pad)

    return out.reshape(B, F_pad)[:, :F_out]


def init_params(key, input_channels=10, output_features=10):
    # Deterministic init mimicking nn.Linear default (uniform +- 1/sqrt(fan_in)).
    k_w, k_b = jax.random.split(key)
    bound = 1.0 / (input_channels ** 0.5)
    # Stored as (C, F) so the kernel does pooled @ W (PyTorch stores (F, C)).
    weight = jax.random.uniform(
        k_w, (input_channels, output_features), jnp.float32, -bound, bound)
    bias = jax.random.uniform(
        k_b, (output_features,), jnp.float32, -bound, bound)
    return weight, bias


def _reference(x, weight, bias):
    return jnp.maximum(
        jnp.mean(x.astype(jnp.float32), axis=(2, 3)) @ weight + bias, 0.0)


if __name__ == "__main__":
    key = jax.random.PRNGKey(0)
    k1, k2, k3, k4, kp = jax.random.split(key, 5)

    C, F_out = 10, 10
    weight, bias = init_params(kp, input_channels=C, output_features=F_out)

    # 1) Module-default sized check (B=2, C=10, 16x16); picks TB=1 -> nb=2.
    x1 = jax.random.normal(k1, (2, C, 16, 16), dtype=jnp.float32)
    o1 = jax.block_until_ready(feature_extractor(x1, weight, bias))
    assert o1.shape == (2, F_out)
    assert jnp.allclose(o1, _reference(x1, weight, bias), atol=1e-5, rtol=1e-5)

    # 2) Tiled path: tight budget forces TB=4 (TR=40), nb=4 batch tiles and
    #    ns=2 spatial reduction steps (accumulator init/finalize exercised).
    x2 = jax.random.normal(k2, (16, C, 16, 16), dtype=jnp.float32)
    o2 = jax.block_until_ready(feature_extractor(
        x2, weight, bias, target_tile_bytes=40 * 128 * 4, spatial_tile_cap=128))
    assert o2.shape == (16, F_out)
    assert jnp.allclose(o2, _reference(x2, weight, bias), atol=1e-5, rtol=1e-5)

    # 3) Ragged spatial extent: HW=400 is not a multiple of 128 -> masked tail.
    x3 = jax.random.normal(k3, (4, C, 20, 20), dtype=jnp.float32)
    o3 = jax.block_until_ready(
        feature_extractor(x3, weight, bias, spatial_tile_cap=128))
    assert o3.shape == (4, F_out)
    assert jnp.allclose(o3, _reference(x3, weight, bias), atol=1e-5, rtol=1e-5)

    # 4) bf16 streaming input (halves HBM bytes); f32 accumulation in-kernel.
    x4 = jax.random.normal(k4, (8, C, 16, 16), jnp.float32).astype(jnp.bfloat16)
    o4 = jax.block_until_ready(feature_extractor(x4, weight, bias))
    assert o4.shape == (8, F_out)
    assert jnp.allclose(o4.astype(jnp.float32), _reference(x4, weight, bias),
                        atol=2e-2, rtol=2e-2)

    print("KERNEL_OK")
</pallas_src>

<mosaic_0001>
module attributes {stable_mosaic.version = 11 : i64} {
  func.func @_feature_extractor_kernel(%arg0: i32, %arg1: i32, %arg2: memref<1x10x256xf32, #tpu.memory_space<vmem>>, %arg3: memref<10x128xf32, #tpu.memory_space<vmem>>, %arg4: memref<1x10xf32, #tpu.memory_space<vmem>>, %arg5: memref<1x128xf32, #tpu.memory_space<vmem>>, %arg6: memref<1x1x128xf32, #tpu.memory_space<vmem>>, %arg7: memref<10x128xf32, #tpu.memory_space<vmem>>) attributes {dimension_semantics = [#tpu.dimension_semantics<parallel>, #tpu.dimension_semantics<arbitrary>], iteration_bounds = array<i64: 2, 1>, scalar_prefetch = 0 : i64, scratch_operands = 1 : i64, tpu.core_type = #tpu.core_type<tc>, window_params = [{transform_indices = @transform_0, window_bounds = array<i64: 1, 10, 256>}, {pipeline_mode = #tpu.pipeline_mode<synchronous>, transform_indices = @transform_1, window_bounds = array<i64: 10, 128>}, {pipeline_mode = #tpu.pipeline_mode<synchronous>, transform_indices = @transform_2, window_bounds = array<i64: 1, 10>}, {pipeline_mode = #tpu.pipeline_mode<synchronous>, transform_indices = @transform_3, window_bounds = array<i64: 1, 128>}, {transform_indices = @transform_4, window_bounds = array<i64: 1, 1, 128>}]} {
    %c0_i32 = arith.constant 0 : i32
    %0 = arith.cmpi eq, %arg1, %c0_i32 : i32
    %1 = arith.extui %0 : i1 to i32
    %c0_i32_0 = arith.constant 0 : i32
    %2 = arith.cmpi ne, %1, %c0_i32_0 : i32
    scf.if %2 {
      %cst_11 = arith.constant 0.000000e+00 : f32
      %16 = vector.broadcast %cst_11 : f32 to vector<10x128xf32>
      %c0_12 = arith.constant 0 : index
      %c0_13 = arith.constant 0 : index
      %17 = vector.load %arg7[%c0_12, %c0_13] : memref<10x128xf32, #tpu.memory_space<vmem>>, vector<10x128xf32>
      tpu.vector_store %arg7[%c0_12, %c0_13], %16 {strides = array<i32>} : memref<10x128xf32, #tpu.memory_space<vmem>>, vector<10x128xf32>,
    } else {
    }
    %cst = arith.constant 0.000000e+00 : f32
    %3 = vector.broadcast %cst : f32 to vector<10x128xf32>
    %c0 = arith.constant 0 : index
    %c0_1 = arith.constant 0 : index
    %c0_2 = arith.constant 0 : index
    %4 = vector.load %arg2[%c0, %c0_1, %c0_2] : memref<1x10x256xf32, #tpu.memory_space<vmem>>, vector<1x10x128xf32>
    %5 = vector.shape_cast %4 : vector<1x10x128xf32> to vector<10x128xf32>
    %6 = arith.addf %3, %5 : vector<10x128xf32>
    %c0_3 = arith.constant 0 : index
    %c0_4 = arith.constant 0 : index
    %c128 = arith.constant 128 : index
    %7 = vector.load %arg2[%c0_3, %c0_4, %c128] : memref<1x10x256xf32, #tpu.memory_space<vmem>>, vector<1x10x128xf32>
    %8 = vector.shape_cast %7 : vector<1x10x128xf32> to vector<10x128xf32>
    %9 = arith.addf %6, %8 : vector<10x128xf32>
    %c0_5 = arith.constant 0 : index
    %c0_6 = arith.constant 0 : index
    %10 = vector.load %arg7[%c0_5, %c0_6] : memref<10x128xf32, #tpu.memory_space<vmem>>, vector<10x128xf32>
    %11 = arith.addf %10, %9 : vector<10x128xf32>
    %c0_7 = arith.constant 0 : index
    %c0_8 = arith.constant 0 : index
    %12 = vector.load %arg7[%c0_7, %c0_8] : memref<10x128xf32, #tpu.memory_space<vmem>>, vector<10x128xf32>
    tpu.vector_store %arg7[%c0_7, %c0_8], %11 {strides = array<i32>} : memref<10x128xf32, #tpu.memory_space<vmem>>, vector<10x128xf32>,
    %c0_i32_9 = arith.constant 0 : i32
    %13 = arith.cmpi eq, %arg1, %c0_i32_9 : i32
    %14 = arith.extui %13 : i1 to i32
    %c0_i32_10 = arith.constant 0 : i32
    %15 = arith.cmpi ne, %14, %c0_i32_10 : i32
    scf.if %15 {
      %c0_11 = arith.constant 0 : index
      %c0_12 = arith.constant 0 : index
      %16 = vector.load %arg7[%c0_11, %c0_12] : memref<10x128xf32, #tpu.memory_space<vmem>>, vector<10x128xf32>
      %cst_13 = arith.constant dense<0.000000e+00> : vector<10xf32>
      %17 = vector.multi_reduction <add>, %16, %cst_13 [1] : vector<10x128xf32> to vector<10xf32>
      %18 = vector.shape_cast %17 : vector<10xf32> to vector<10x1xf32>
      %c0_14 = arith.constant 0 : index
      %c0_15 = arith.constant 0 : index
      %19 = vector.load %arg3[%c0_14, %c0_15] : memref<10x128xf32, #tpu.memory_space<vmem>>, vector<10x128xf32>
      %20 = vector.broadcast %18 : vector<10x1xf32> to vector<10x128xf32>
      %21 = arith.mulf %20, %19 : vector<10x128xf32>
      %c0_16 = arith.constant 0 : index
      %c0_17 = arith.constant 0 : index
      %22 = vector.load %arg4[%c0_16, %c0_17] : memref<1x10xf32, #tpu.memory_space<vmem>>, vector<1x10xf32>
      %cst_18 = arith.constant dense<0.000000e+00> : vector<1x128xf32>
      %23 = tpu.matmul %22, %21, %cst_18 {dimension_numbers = #tpu.dot_dimension_numbers<[1], [0], [0], [1], [0, 0, 1, 1], [], []>} : vector<1x10xf32>, vector<10x128xf32>, vector<1x128xf32> -> vector<1x128xf32>
      %c0_19 = arith.constant 0 : index
      %c0_20 = arith.constant 0 : index
      %24 = vector.load %arg5[%c0_19, %c0_20] : memref<1x128xf32, #tpu.memory_space<vmem>>, vector<1x128xf32>
      %25 = arith.addf %23, %24 : vector<1x128xf32>
      %cst_21 = arith.constant 0.000000e+00 : f32
      %26 = vector.broadcast %cst_21 : f32 to vector<1x128xf32>
      %27 = arith.maximumf %25, %26 : vector<1x128xf32>
      %c0_22 = arith.constant 0 : index
      %c0_23 = arith.constant 0 : index
      %c0_24 = arith.constant 0 : index
      %28 = vector.load %arg6[%c0_22, %c0_23, %c0_24] : memref<1x1x128xf32, #tpu.memory_space<vmem>>, vector<1x1x128xf32>
      %29 = vector.shape_cast %28 : vector<1x1x128xf32> to vector<1x128xf32>
      %30 = vector.shape_cast %27 : vector<1x128xf32> to vector<1x1x128xf32>
      tpu.vector_store %arg6[%c0_22, %c0_23, %c0_24], %30 {strides = array<i32>} : memref<1x1x128xf32, #tpu.memory_space<vmem>>, vector<1x1x128xf32>,
    } else {
    }
    return
  }
  func.func @transform_0(%arg0: i32, %arg1: i32) -> (i32, i32, i32) {
    %c0_i32 = arith.constant 0 : i32
    %c0_i32_0 = arith.constant 0 : i32
    return %arg0, %c0_i32, %arg1 : i32, i32, i32
  }
  func.func @transform_1(%arg0: i32, %arg1: i32) -> (i32, i32) {
    %c0_i32 = arith.constant 0 : i32
    %c0_i32_0 = arith.constant 0 : i32
    %c0_i32_1 = arith.constant 0 : i32
    return %c0_i32, %c0_i32_0 : i32, i32
  }
  func.func @transform_2(%arg0: i32, %arg1: i32) -> (i32, i32) {
    %c0_i32 = arith.constant 0 : i32
    %c0_i32_0 = arith.constant 0 : i32
    %c0_i32_1 = arith.constant 0 : i32
    return %c0_i32, %c0_i32_0 : i32, i32
  }
  func.func @transform_3(%arg0: i32, %arg1: i32) -> (i32, i32) {
    %c0_i32 = arith.constant 0 : i32
    %c0_i32_0 = arith.constant 0 : i32
    %c0_i32_1 = arith.constant 0 : i32
    return %c0_i32, %c0_i32_0 : i32, i32
  }
  func.func @transform_4(%arg0: i32, %arg1: i32) -> (i32, i32, i32) {
    %c0_i32 = arith.constant 0 : i32
    %c0_i32_0 = arith.constant 0 : i32
    %c0_i32_1 = arith.constant 0 : i32
    return %arg0, %c0_i32, %c0_i32_0 : i32, i32, i32
  }
}

</mosaic_0001>

<bundles_post_ra>
// kernel: tpu_custom_call.1
= control target key start
LH: loop header
LB: loop body
LE: loop exit
PB: predicated region body
PF: predicated region fallthrough
CT: control target
= control target key end

     0   :  { %9 = vsyncpa [#allocation4], 0  ;;  %s718_s0 = inlined_call_operand.vmem [shape: f32[2,10,256], index: 0, kind: input, shape index: {}]   ;;  %s719_s1 = inlined_call_operand.vmem [shape: f32[10,128], index: 1, kind: input, shape index: {}]   ;;  %s720_s2 = inlined_call_operand.vmem [shape: f32[1,10], index: 2, kind: input, shape index: {}]   ;;  %s721_s3 = inlined_call_operand.vmem [shape: f32[1,128], index: 3, kind: input, shape index: {}]   ;;  %s722_s4 = inlined_call_operand.hbm [shape: f32[2,1,128], index: 4, kind: output, shape index: {}]  }
   0x1   :  { %11 = vsyncpa [#allocation4 + $0x1], 0  ;;  %s607_s15 = smov 0   ;;  %s609_s16 = smov 0  }
   0x2   :  { %s611_s17 = smov 0   ;;  %s613_s18 = smov 0  }
   0x3   :  { %s615_s19 = smov 0   ;;  %s617_s20 = smov 0  }
   0x4 LB: > { %s421_s21 = sadd.s32 4294967295, %s577_s20   ;;  %s422_s22 = sadd.s32 4294967294, %s577_s20   ;;  %s577_s20 = sphi %s617_s20, %s17_s20   ;;  %s573_s19 = sphi %s615_s19, %s729_s19   ;;  %s569_s18 = sphi %s613_s18, %s728_s18   ;;  %s565_s17 = sphi %s611_s17, %s727_s17   ;;  %s561_s16 = sphi %s609_s16, %s726_s16   ;;  %s557_s15 = sphi %s607_s15, %s725_s15  }
   0x5   : > { %s29_s23 = sadd.s32 1, %s573_s19  ;;  %s127_s24 = sadd.s32 1, %s565_s17 }
   0x6   : > { %p31_p0 = scmp.ge.s32.totalorder %s29_s23, 2  ;;  %p137_p1 = scmp.ne.s32.totalorder %s565_s17, %s561_s16 }
   0x7   : > { %p138_p2 = scmp.eq.s32.totalorder %s421_s21, 1  ;;  %p143_p3 = scmp.ne.s32.totalorder %s561_s16, %s557_s15 }
   0x8   : > { %s731_s23 = smov (%p31_p0, %s29_s23), 0  ;;  %p144_p5 = scmp.eq.s32.totalorder %s422_s22, 1 }
   0x9   : > { %p647_p4 = por %p138_p2, %p137_p1  ;;  %s124_s26 = ssub.s32 %s573_s19, %s731_s23 }
   0xa   : > { %p425_p6 = scmp.ge.s32.totalorder %s577_s20, 1  ;;  %p125_p7 = scmp.eq.s32.totalorder %s124_s26, 0 }
   0xb   : > { %p654_p8 = por %p144_p5, %p143_p3  ;;  %p184_p9 = scmp.lt.s32.totalorder %s577_s20, 3 }
   0xc   : > { %s660_s28 = scalar_select %p125_p7, %s565_s17, %s127_s24  }
   0xd   : > { %p185_p10 = pnand %p425_p6, %p184_p9 }
   0xe   : > { %p214_p11 = scmp.lt.s32.totalorder (!%p185_p10), %s569_s18, 1  ;;  %s211_s14 = sand.u32 (!%p185_p10), 1, %s561_s16  }
   0xf   : > { %188 = sbr.rel (%p185_p10) target bundleno = 395 (0x18b), region = 36  ;;  %s430_s24 = sshll.u32 (!%p185_p10), %s569_s18, 4 }
  0x10   : > { %s212_s26 = scalar_lea.vmem (!%p185_p10), [#allocation3], %s211_s14  ;;  %s350_s6 = scalar_lea.hbm (!%p185_p10), %s722_s4, %s430_s24 }
  0x11   : > { %s581_s9 = smov (!%p185_p10), [#allocation3]  }
  0x12   : > { %s505_s10 = sshll.u32 (!%p185_p10), %s581_s9, 4  ;;  %s506_s10 = int_to_ptr.vmem [resolvable:$false] %s505_s10 }
  0x14   : > { %v579_v0 = vmov 0.0   ;;  %s215_s29 = scalar_select %p214_p11, %s569_s18, 1  ;;  %vm250_vm0 = vcmask 1041408   ;;  %vm580_vm1 = vmmov 0   ;;  %v255_v11 = vld [vmem:[%s719_s1 + $0x8] sm:$0x3] }
  0x15   : > { %228 = vst [vmem:[#allocation2 + $0x8] sm:$0x3] %v579_v0  ;;  %437 = vmatprep.subr.mxu0 %v579_v0  ;;  %441 = vmatprep.mubr.msk.f32.mxu0 %vm580_vm1, %v579_v0  ;;  %v254_v14 = vld [vmem:[%s719_s1] sm:$0xff]  ;;  %vm260_vm2 = vcmask 80896   ;;  %s507_s18 = scalar_lea.vmem %s506_s10, 32 }
  0x16   : > { %s433_s30 = sshll.u32 %s215_s29, 5  ;;  %v258_v17 = vld [vmem:[%s720_s2] sm:$0x1]  ;;  %s352_s29 = sshll.u32 %s212_s26, 4  ;;  %s353_s29 = int_to_ptr.vmem [resolvable:$true] %s352_s29 }
  0x17   : > { %s221_s7 = scalar_lea.vmem %s718_s0, %s433_s30  ;;  %v259_v18 = vld [vmem:[%s721_s3] sm:$0x1]  ;;  %s501_s8 = scalar_lea.vmem %s353_s29, 16 }
  0x18   : > { %v230_v1 = vld [vmem:[%s221_s7 + $0x10] sm:$0x3]  ;;  %v234_v2 = vld [vmem:[%s221_s7 + $0x18] sm:$0x3]  ;;  %v229_v3 = vld [vmem:[%s221_s7] sm:$0xff]  ;;  %p502_p12 = scmp.ne.s32.totalorder %s353_s29, %s501_s8  ;;  %p508_p1 = scmp.lt.s32.totalorder %s353_s29, %s506_s10 }
  0x19   : > { %v236_v4 = vadd.f32 %v234_v2, %v230_v1  ;;  %v233_v5 = vld [vmem:[%s221_s7 + $0x8] sm:$0xff]  ;;  %s340_s7 = scalar_lea.sflag [#allocation4], %s211_s14  ;;  %p509_p2 = scmp.lt.s32.totalorder %s507_s18, %s501_s8 }
  0x1a   : > { %v235_v7 = vadd.f32 %v233_v5, %v229_v3  ;;  %p503_p13 = pnand %p502_p12, %p647_p4 }
  0x1b   : > { %p510_p3 = por %p509_p2, %p508_p1 }
  0x1c   : > { %v238_v6 = vld [vmem:[#allocation2 + $0x8] sm:$0x3]  ;;  %p504_p0 = pneg %p503_p13 }
  0x1d   : > { %v240_v8 = vadd.f32 %v238_v6, %v236_v4 }
  0x1e   : > { %p511_p5 = pnand %p510_p3, %p504_p0 }
  0x1f   : > { %242 = vst [vmem:[#allocation2 + $0x8] sm:$0x3] %v240_v8 }
  0x26   : > { %v247_v9 = vld [vmem:[#allocation2 + $0x8] sm:$0x3] }
  0x27   : > { %v251_v10 = vsel %vm250_vm0, %v247_v9, 0.0 }
  0x28   : > { %252 = vadd.xlane.f32.xlu0 %v251_v10 }
  0x2c   : > { %248 = vadd.xlane.f32.xlu0 %v235_v7 }
  0xb1   : > { %v253_v12 = vpop.xlane.xlu0 %252 }
  0xb2   : > { %v257_v13 = vmul.f32 %v255_v11, %v253_v12 }
  0xb4   : > { %438 = vmatpush3.msk.msra.mxu0 %vm250_vm0, %v257_v13 }
  0xb5   : > { %v249_v15 = vpop.xlane.xlu0 %248  ;;  %439 = vmatprep.subr.mxu0 %v579_v0 }
  0xb6   : > { %v256_v16 = vmul.f32 %v254_v14, %v249_v15 }
  0xb8   : > { %440 = vmatpush3.msra.mxu0 %v256_v16 }
  0xb9   : > { %442 = vmatmul.mubr.msk.f32.vlgmr.msra.gmra.mxu0 %vm260_vm2, %v258_v17 }
 0x179   : > { %v333_v19 = vpop.f32.mrf.mxu0 }
 0x17a   : > { %v334_v20 = vadd.f32 %v333_v19, %v259_v18 }
 0x17b   : > { %v443_v21 = vpop.f32.mrf.mxu0 }
 0x17c   : > { %v337_v22 = vmax.f32 %v334_v20, 0.0 }
 0x17e   : > { %338 = vst [vmem:[%s212_s26] sm:$0x1] %v337_v22 }
 0x17f   : > { %514 = shalt.err (!%p511_p5)
}
 0x180   : > { %s515_s11 = scalar_lea.hbm %s350_s6, 16  ;;  %s519_s14 = scalar_lea.hbm %s722_s4, 32 }
 0x181   : > { %p516_p6 = scmp.ne.s32.totalorder %s350_s6, %s515_s11  ;;  %p520_p10 = scmp.lt.s32.totalorder %s350_s6, %s722_s4 }
 0x182   : > { %p521_p11 = scmp.lt.s32.totalorder %s519_s14, %s515_s11 }
 0x183   : > { %p517_p7 = pnand %p516_p6, %p647_p4 }
 0x184   : > { %p522_p12 = por %p521_p11, %p520_p10 }
 0x185   : > { %p518_p9 = pneg %p517_p7 }
 0x187   : > { %p523_p13 = pnand %p522_p12, %p518_p9 }
 0x189   : > { %526 = shalt.err (!%p523_p13)
}
 0x18a   : > { %444 = dma.vmem_to_hbm [thread:$0]  (%p647_p4), %s353_s29, 16, %s350_s6, %s340_s7  }
 0x18b PF: > { %p450_p0 = scmp.ge.s32.totalorder %s577_s20, 2  ;;  %s364_s24 = sand.u32 1, %s557_s15  }
 0x18c   : > { %s365_s26 = scalar_lea.sflag [#allocation4], %s364_s24 }
 0x18d   : > { %p447_p1 = pnand %p450_p0, %p654_p8 }
 0x18f   : > { %p448_p2 = pneg %p447_p1 }
 0x191   : > { %552 = dma.done.wait (%p448_p2), %s365_s26, 16  }
 0x192   : > { %554 = vsyncadd (%p448_p2), %s365_s26, 4294967280  ;;  %s17_s20 = sadd.s32 1, %s577_s20   ;;  %s725_s15 = smov %s561_s16 }
 0x193   : > { %p14_p3 = scmp.ge.s32.totalorder %s17_s20, 4   ;;  %s726_s16 = smov %s565_s17 }
 0x194   : > { %s727_s17 = smov %s660_s28  ;;  %s728_s18 = smov %s573_s19 }
 0x195   : > { %s729_s19 = smov %s731_s23  ;;  %16 = sbr.rel (!%p14_p3) target bundleno = 4 (0x4), region = 79 }
 0x19a   :  { %369 = vsyncpa [#allocation4], 1 }
 0x19b   :  { %371 = vsyncpa [#allocation4 + $0x1], 1 }

</bundles_post_ra>
